<compile_context>
chip_gen: v5e
topology: v5e:2x2
jax: 0.10.0
libtpu: 0.0.40
codegen_flags: <defaults>
</compile_context>

<pallas_src>
from functools import partial

import jax
import jax.numpy as jnp
from jax.experimental import pallas as pl
from jax.experimental.pallas import tpu as pltpu


def _device_config():
    """Per-TPU-generation defaults: row tile, d_ff tile, tk granularity,
    VMEM budget, TensorCores per chip."""
    try:
        kind = jax.devices()[0].device_kind.lower()
    except Exception:
        kind = ""
    if "v5 lite" in kind or "v5e" in kind or "v5lite" in kind:
        # 4x128^2 MXU, ~240 FLOP/B roofline knee -> tm=512 is plenty.
        return dict(tm=512, tk=512, tk_gran=128, vmem=64 * 2**20, cores=1)
    if "v6" in kind:
        # ~650 FLOP/B knee -> big row tile; 2x256^2 MXU -> tk multiple of 256.
        return dict(tm=1024, tk=512, tk_gran=256, vmem=100 * 2**20, cores=1)
    if "v7" in kind or "tpu7" in kind:
        # 64 MiB VMEM, 2 TCs: smaller tiles, headroom, even row-tile count.
        return dict(tm=512, tk=512, tk_gran=256, vmem=52 * 2**20, cores=2)
    # Unknown generation: conservative middle ground.
    return dict(tm=512, tk=512, tk_gran=256, vmem=64 * 2**20, cores=1)


def prepare_ffn_params(w1, b1, w2, b2, *, tk=None, operand_dtype=jnp.bfloat16):
    """One-time (init-time) weight preparation.

    Casts the matmul operands to the MXU-native dtype and (only if necessary)
    pads d_ff up to a multiple of the reduction tile tk, so the per-call
    wrapper never touches the weights again.

    Returns (w1p, b1p, w2p, b2p, tk) with
      w1p: (d_model, dff_pad) operand_dtype     b1p: (1, dff_pad) f32
      w2p: (dff_pad, d_model) operand_dtype     b2p: (1, d_model) f32
    and tk dividing dff_pad exactly.
    """
    d_model, d_ff = w1.shape
    cfg = _device_config()
    if tk is None:
        tk, gran = cfg["tk"], cfg["tk_gran"]
    else:
        gran = 128  # explicit tk: only enforce lane alignment
    tk = min(tk, pl.cdiv(d_ff, gran) * gran)
    tk = max(gran, (tk // gran) * gran)
    # Prefer a tk that divides d_ff exactly (no padding, no dead MXU lanes).
    for cand in range(tk, gran - 1, -gran):
        if d_ff % cand == 0:
            tk = cand
            break
    dff_pad = pl.cdiv(d_ff, tk) * tk
    if dff_pad != d_ff:
        w1 = jnp.pad(w1, ((0, 0), (0, dff_pad - d_ff)))
        b1 = jnp.pad(b1, ((0, dff_pad - d_ff),))
        w2 = jnp.pad(w2, ((0, dff_pad - d_ff), (0, 0)))
    w1p = jnp.asarray(w1, operand_dtype)
    b1p = jnp.asarray(b1, jnp.float32).reshape(1, dff_pad)
    w2p = jnp.asarray(w2, operand_dtype)
    b2p = jnp.asarray(b2, jnp.float32).reshape(1, d_model)
    return w1p, b1p, w2p, b2p, tk


def ffn_kernel(x_ref, w1_ref, b1_ref, w2_ref, b2_ref, o_ref, acc_ref):
    # x_ref:  (tm, d_model)  input dtype   w1_ref: (d_model, tk)  bf16
    # b1_ref: (1, tk)        f32           w2_ref: (tk, d_model)  bf16
    # b2_ref: (1, d_model)   f32           o_ref:  (tm, d_model)  out dtype
    # acc_ref:(tm, d_model)  f32 accumulator across the d_ff grid axis
    k = pl.program_id(1)

    @pl.when(k == 0)
    def _init():
        acc_ref[...] = jnp.zeros_like(acc_ref)

    # In-kernel cast of the activation tile to the MXU operand dtype (avoids a
    # separate XLA cast pass and keeps x's HBM traffic at its native width).
    x = x_ref[...].astype(w1_ref.dtype)
    # First matmul on the MXU (bf16 operands, f32 accumulation).
    h = jnp.dot(x, w1_ref[...], preferred_element_type=jnp.float32)
    # Bias + ReLU in f32 on the VPU.
    h = jnp.maximum(h + b1_ref[...], 0.0)

    # TODO(synk): training-mode dropout on h (pltpu.prng_seed +
    # pltpu.stateful_bernoulli); eval mode => identity.

    # Partial second matmul, accumulated in f32 across d_ff chunks.
    acc_ref[...] += jnp.dot(h.astype(w2_ref.dtype), w2_ref[...],
                            preferred_element_type=jnp.float32)

    @pl.when(k == pl.num_programs(1) - 1)
    def _finalize():
        o_ref[...] = (acc_ref[...] + b2_ref[...]).astype(o_ref.dtype)


@partial(jax.jit, static_argnames=("tk", "tm", "vmem_limit_bytes"))
def positionwise_feed_forward(x, w1, b1, w2, b2, *, tk, tm=None,
                              vmem_limit_bytes=None):
    """x: (batch, seq, d_model), any float dtype.

    w1/b1/w2/b2/tk come from prepare_ffn_params (weights already bf16 and
    padded so that tk divides w1.shape[1] exactly).
    """
    batch, seq, d_model = x.shape
    dff_pad = w1.shape[1]
    assert dff_pad % tk == 0, "use prepare_ffn_params to choose tk"
    n = batch * seq
    out_dtype = x.dtype

    cfg = _device_config()
    if tm is None:
        tm = cfg["tm"]
    if vmem_limit_bytes is None:
        vmem_limit_bytes = cfg["vmem"]

    # Row tile: multiple of 16 (bf16 packs 2 rows/sublane), clamped to the
    # 16-aligned row count.
    n16 = ((n + 15) // 16) * 16
    tm = max(16, min((tm // 16) * 16, n16))

    in_bytes = jnp.dtype(x.dtype).itemsize
    op_bytes = jnp.dtype(w1.dtype).itemsize
    out_bytes = jnp.dtype(out_dtype).itemsize

    # Keep double-buffered tiles + f32 accumulator inside the VMEM budget
    # (critical on v7x's 64 MiB VMEM); shrink tm if needed.
    def _vmem_bytes(tm_):
        return (2 * tm_ * d_model * in_bytes        # x tile
                + 2 * d_model * tk * op_bytes       # W1 chunk
                + 2 * tk * d_model * op_bytes       # W2 chunk
                + 2 * (tk + d_model) * 4            # bias chunks
                + 2 * tm_ * d_model * out_bytes     # out tile
                + tm_ * d_model * 4)                # f32 accumulator

    while tm > 64 and _vmem_bytes(tm) > int(0.9 * vmem_limit_bytes):
        tm = max(64, ((tm // 2) // 16) * 16)

    # Megacore (v7x): keep the row-tile count even so both TCs get work.
    if cfg["cores"] > 1:
        tiles = pl.cdiv(n16, tm)
        if tiles % 2 == 1 and n16 > 16:
            tm = max(16, ((pl.cdiv(n16, tiles + 1) + 15) // 16) * 16)

    n_pad = pl.cdiv(n, tm) * tm
    x2d = x.reshape(n, d_model)
    if n_pad != n:
        x2d = jnp.pad(x2d, ((0, n_pad - n), (0, 0)))

    nk = dff_pad // tk
    num_row_tiles = n_pad // tm

    # Serpentine d_ff-chunk order: odd row tiles walk the chunks in reverse so
    # the last W1/W2 chunk of row tile i is reused as the first of tile i+1.
    def kmap(i, k):
        return k + (i % 2) * (nk - 1 - 2 * k)

    cost = pl.CostEstimate(
        flops=4 * n_pad * d_model * dff_pad,          # two matmuls
        transcendentals=0,
        bytes_accessed=(n_pad * d_model * in_bytes                      # x
                        + (w1.size + w2.size) * op_bytes * num_row_tiles
                        + (b1.size + b2.size) * 4 * num_row_tiles
                        + n_pad * d_model * out_bytes),
    )

    # NOTE: if a profile ever shows exposed DMA on the weight stream (only
    # likely at small tm), add pipeline_mode=pl.Buffered(3) to the W1/W2
    # BlockSpecs below (check the v7x VMEM budget first).
    out = pl.pallas_call(
        ffn_kernel,
        out_shape=jax.ShapeDtypeStruct((n_pad, d_model), out_dtype),
        grid_spec=pltpu.PrefetchScalarGridSpec(
            num_scalar_prefetch=0,
            grid=(num_row_tiles, nk),
            in_specs=[
                pl.BlockSpec((tm, d_model), lambda i, k: (i, 0)),          # x
                pl.BlockSpec((d_model, tk), lambda i, k: (0, kmap(i, k))),  # W1
                pl.BlockSpec((1, tk), lambda i, k: (0, kmap(i, k))),        # b1
                pl.BlockSpec((tk, d_model), lambda i, k: (kmap(i, k), 0)),  # W2
                pl.BlockSpec((1, d_model), lambda i, k: (0, 0)),            # b2
            ],
            out_specs=pl.BlockSpec((tm, d_model), lambda i, k: (i, 0)),
            scratch_shapes=[pltpu.VMEM((tm, d_model), jnp.float32)],
        ),
        compiler_params=pltpu.CompilerParams(
            dimension_semantics=("parallel", "arbitrary"),
            vmem_limit_bytes=vmem_limit_bytes,
        ),
        cost_estimate=cost,
    )(x2d, w1, b1, w2, b2)

    return out[:n].reshape(batch, seq, d_model)


def init_params(key, d_model, d_ff, dtype=jnp.float32):
    """Deterministic nn.Linear-style init. Weights returned already transposed
    for row-major matmul: w1 (d_model, d_ff), w2 (d_ff, d_model)."""
    k1, k2, k3, k4 = jax.random.split(key, 4)
    bound1 = 1.0 / (d_model ** 0.5)
    bound2 = 1.0 / (d_ff ** 0.5)
    w1 = jax.random.uniform(k1, (d_model, d_ff), dtype, -bound1, bound1)
    b1 = jax.random.uniform(k2, (d_ff,), dtype, -bound1, bound1)
    w2 = jax.random.uniform(k3, (d_ff, d_model), dtype, -bound2, bound2)
    b2 = jax.random.uniform(k4, (d_model,), dtype, -bound2, bound2)
    return w1, b1, w2, b2


if __name__ == "__main__":
    batch, seq, d_model, d_ff = 2, 64, 128, 256

    key = jax.random.PRNGKey(0)
    kx, kp = jax.random.split(key)
    x = jax.random.normal(kx, (batch, seq, d_model), jnp.float32)
    w1, b1, w2, b2 = init_params(kp, d_model, d_ff)

    # f32 reference (eval-mode dropout == identity).
    ref = jnp.maximum(x @ w1 + b1, 0.0) @ w2 + b2

    # Init-time weight preparation (cast + pad hoisted out of the forward).
    prep_auto = prepare_ffn_params(w1, b1, w2, b2)        # auto tk (single step)
    prep_k2 = prepare_ffn_params(w1, b1, w2, b2, tk=128)  # forces 2 k-steps

    for (w1p, b1p, w2p, b2p, tk) in (prep_auto, prep_k2):
        out = positionwise_feed_forward(x, w1p, b1p, w2p, b2p, tk=tk)
        out = jax.block_until_ready(out)
        assert out.shape == (batch, seq, d_model)
        # bf16 matmul operands (f32 accumulation) -> loosened tolerance.
        assert jnp.allclose(out, ref, atol=2e-2, rtol=2e-2), (
            float(jnp.max(jnp.abs(out - ref))))

    print("KERNEL_OK")
</pallas_src>

<mosaic_0001>
module attributes {stable_mosaic.version = 11 : i64} {
  func.func @ffn_kernel(%arg0: i32, %arg1: i32, %arg2: memref<128x128xf32, #tpu.memory_space<vmem>>, %arg3: memref<128x256xbf16, #tpu.memory_space<vmem>>, %arg4: memref<1x256xf32, #tpu.memory_space<vmem>>, %arg5: memref<256x128xbf16, #tpu.memory_space<vmem>>, %arg6: memref<1x128xf32, #tpu.memory_space<vmem>>, %arg7: memref<128x128xf32, #tpu.memory_space<vmem>>, %arg8: memref<128x128xf32, #tpu.memory_space<vmem>>) attributes {dimension_semantics = [#tpu.dimension_semantics<parallel>, #tpu.dimension_semantics<arbitrary>], iteration_bounds = array<i64: 1, 1>, scalar_prefetch = 0 : i64, scratch_operands = 1 : i64, tpu.core_type = #tpu.core_type<tc>, window_params = [{transform_indices = @transform_0, window_bounds = array<i64: 128, 128>}, {transform_indices = @transform_1, window_bounds = array<i64: 128, 256>}, {transform_indices = @transform_2, window_bounds = array<i64: 1, 256>}, {transform_indices = @transform_3, window_bounds = array<i64: 256, 128>}, {pipeline_mode = #tpu.pipeline_mode<synchronous>, transform_indices = @transform_4, window_bounds = array<i64: 1, 128>}, {transform_indices = @transform_5, window_bounds = array<i64: 128, 128>}]} {
    %c0_i32 = arith.constant 0 : i32
    %0 = arith.cmpi eq, %arg1, %c0_i32 : i32
    %1 = arith.extui %0 : i1 to i32
    %c0_i32_0 = arith.constant 0 : i32
    %2 = arith.cmpi ne, %1, %c0_i32_0 : i32
    scf.if %2 {
      %cst_16 = arith.constant 0.000000e+00 : f32
      %21 = vector.broadcast %cst_16 : f32 to vector<128x128xf32>
      %c0_17 = arith.constant 0 : index
      %c0_18 = arith.constant 0 : index
      %22 = vector.load %arg8[%c0_17, %c0_18] : memref<128x128xf32, #tpu.memory_space<vmem>>, vector<128x128xf32>
      tpu.vector_store %arg8[%c0_17, %c0_18], %21 {strides = array<i32>} : memref<128x128xf32, #tpu.memory_space<vmem>>, vector<128x128xf32>,
    } else {
    }
    %c0 = arith.constant 0 : index
    %c0_1 = arith.constant 0 : index
    %3 = vector.load %arg2[%c0, %c0_1] : memref<128x128xf32, #tpu.memory_space<vmem>>, vector<128x128xf32>
    %4 = arith.truncf %3 : vector<128x128xf32> to vector<128x128xbf16>
    %c0_2 = arith.constant 0 : index
    %c0_3 = arith.constant 0 : index
    %5 = vector.load %arg3[%c0_2, %c0_3] : memref<128x256xbf16, #tpu.memory_space<vmem>>, vector<128x256xbf16>
    %cst = arith.constant dense<0.000000e+00> : vector<128x256xf32>
    %6 = tpu.matmul %4, %5, %cst {dimension_numbers = #tpu.dot_dimension_numbers<[1], [0], [0], [1], [0, 0, 1, 1], [], []>} : vector<128x128xbf16>, vector<128x256xbf16>, vector<128x256xf32> -> vector<128x256xf32>
    %c0_4 = arith.constant 0 : index
    %c0_5 = arith.constant 0 : index
    %7 = vector.load %arg4[%c0_4, %c0_5] : memref<1x256xf32, #tpu.memory_space<vmem>>, vector<1x256xf32>
    %8 = vector.broadcast %7 : vector<1x256xf32> to vector<128x256xf32>
    %9 = arith.addf %6, %8 : vector<128x256xf32>
    %cst_6 = arith.constant 0.000000e+00 : f32
    %10 = vector.broadcast %cst_6 : f32 to vector<128x256xf32>
    %11 = arith.maximumf %9, %10 : vector<128x256xf32>
    %c0_7 = arith.constant 0 : index
    %c0_8 = arith.constant 0 : index
    %12 = vector.load %arg8[%c0_7, %c0_8] : memref<128x128xf32, #tpu.memory_space<vmem>>, vector<128x128xf32>
    %13 = arith.truncf %11 : vector<128x256xf32> to vector<128x256xbf16>
    %c0_9 = arith.constant 0 : index
    %c0_10 = arith.constant 0 : index
    %14 = vector.load %arg5[%c0_9, %c0_10] : memref<256x128xbf16, #tpu.memory_space<vmem>>, vector<256x128xbf16>
    %cst_11 = arith.constant dense<0.000000e+00> : vector<128x128xf32>
    %15 = tpu.matmul %13, %14, %cst_11 {dimension_numbers = #tpu.dot_dimension_numbers<[1], [0], [0], [1], [0, 0, 1, 1], [], []>} : vector<128x256xbf16>, vector<256x128xbf16>, vector<128x128xf32> -> vector<128x128xf32>
    %16 = arith.addf %12, %15 : vector<128x128xf32>
    %c0_12 = arith.constant 0 : index
    %c0_13 = arith.constant 0 : index
    %17 = vector.load %arg8[%c0_12, %c0_13] : memref<128x128xf32, #tpu.memory_space<vmem>>, vector<128x128xf32>
    tpu.vector_store %arg8[%c0_12, %c0_13], %16 {strides = array<i32>} : memref<128x128xf32, #tpu.memory_space<vmem>>, vector<128x128xf32>,
    %c0_i32_14 = arith.constant 0 : i32
    %18 = arith.cmpi eq, %arg1, %c0_i32_14 : i32
    %19 = arith.extui %18 : i1 to i32
    %c0_i32_15 = arith.constant 0 : i32
    %20 = arith.cmpi ne, %19, %c0_i32_15 : i32
    scf.if %20 {
      %c0_16 = arith.constant 0 : index
      %c0_17 = arith.constant 0 : index
      %21 = vector.load %arg8[%c0_16, %c0_17] : memref<128x128xf32, #tpu.memory_space<vmem>>, vector<128x128xf32>
      %c0_18 = arith.constant 0 : index
      %c0_19 = arith.constant 0 : index
      %22 = vector.load %arg6[%c0_18, %c0_19] : memref<1x128xf32, #tpu.memory_space<vmem>>, vector<1x128xf32>
      %23 = vector.broadcast %22 : vector<1x128xf32> to vector<128x128xf32>
      %24 = arith.addf %21, %23 : vector<128x128xf32>
      %c0_20 = arith.constant 0 : index
      %c0_21 = arith.constant 0 : index
      %25 = vector.load %arg7[%c0_20, %c0_21] : memref<128x128xf32, #tpu.memory_space<vmem>>, vector<128x128xf32>
      tpu.vector_store %arg7[%c0_20, %c0_21], %24 {strides = array<i32>} : memref<128x128xf32, #tpu.memory_space<vmem>>, vector<128x128xf32>,
    } else {
    }
    return
  }
  func.func @transform_0(%arg0: i32, %arg1: i32) -> (i32, i32) {
    %c0_i32 = arith.constant 0 : i32
    %c0_i32_0 = arith.constant 0 : i32
    return %arg0, %c0_i32 : i32, i32
  }
  func.func @transform_1(%arg0: i32, %arg1: i32) -> (i32, i32) {
    %c2_i32 = arith.constant 2 : i32
    %c0_i32 = arith.constant 0 : i32
    %0 = arith.cmpi eq, %c2_i32, %c0_i32 : i32
    %c1_i32 = arith.constant 1 : i32
    %1 = arith.select %0, %c1_i32, %c2_i32 : i32
    %2 = arith.remsi %arg0, %1 : i32
    %c0_i32_0 = arith.constant 0 : i32
    %3 = arith.cmpi ne, %2, %c0_i32_0 : i32
    %c0_i32_1 = arith.constant 0 : i32
    %4 = arith.cmpi slt, %2, %c0_i32_1 : i32
    %c0_i32_2 = arith.constant 0 : i32
    %5 = arith.cmpi slt, %1, %c0_i32_2 : i32
    %6 = arith.xori %4, %5 : i1
    %7 = arith.andi %6, %3 : i1
    %8 = arith.addi %2, %1 : i32
    %9 = arith.select %7, %8, %2 : i32
    %c2_i32_3 = arith.constant 2 : i32
    %10 = arith.muli %c2_i32_3, %arg1 : i32
    %c0_i32_4 = arith.constant 0 : i32
    %11 = arith.subi %c0_i32_4, %10 : i32
    %12 = arith.muli %9, %11 : i32
    %13 = arith.addi %arg1, %12 : i32
    %c0_i32_5 = arith.constant 0 : i32
    %c0_i32_6 = arith.constant 0 : i32
    return %c0_i32_5, %13 : i32, i32
  }
  func.func @transform_2(%arg0: i32, %arg1: i32) -> (i32, i32) {
    %c2_i32 = arith.constant 2 : i32
    %c0_i32 = arith.constant 0 : i32
    %0 = arith.cmpi eq, %c2_i32, %c0_i32 : i32
    %c1_i32 = arith.constant 1 : i32
    %1 = arith.select %0, %c1_i32, %c2_i32 : i32
    %2 = arith.remsi %arg0, %1 : i32
    %c0_i32_0 = arith.constant 0 : i32
    %3 = arith.cmpi ne, %2, %c0_i32_0 : i32
    %c0_i32_1 = arith.constant 0 : i32
    %4 = arith.cmpi slt, %2, %c0_i32_1 : i32
    %c0_i32_2 = arith.constant 0 : i32
    %5 = arith.cmpi slt, %1, %c0_i32_2 : i32
    %6 = arith.xori %4, %5 : i1
    %7 = arith.andi %6, %3 : i1
    %8 = arith.addi %2, %1 : i32
    %9 = arith.select %7, %8, %2 : i32
    %c2_i32_3 = arith.constant 2 : i32
    %10 = arith.muli %c2_i32_3, %arg1 : i32
    %c0_i32_4 = arith.constant 0 : i32
    %11 = arith.subi %c0_i32_4, %10 : i32
    %12 = arith.muli %9, %11 : i32
    %13 = arith.addi %arg1, %12 : i32
    %c0_i32_5 = arith.constant 0 : i32
    %c0_i32_6 = arith.constant 0 : i32
    return %c0_i32_5, %13 : i32, i32
  }
  func.func @transform_3(%arg0: i32, %arg1: i32) -> (i32, i32) {
    %c2_i32 = arith.constant 2 : i32
    %c0_i32 = arith.constant 0 : i32
    %0 = arith.cmpi eq, %c2_i32, %c0_i32 : i32
    %c1_i32 = arith.constant 1 : i32
    %1 = arith.select %0, %c1_i32, %c2_i32 : i32
    %2 = arith.remsi %arg0, %1 : i32
    %c0_i32_0 = arith.constant 0 : i32
    %3 = arith.cmpi ne, %2, %c0_i32_0 : i32
    %c0_i32_1 = arith.constant 0 : i32
    %4 = arith.cmpi slt, %2, %c0_i32_1 : i32
    %c0_i32_2 = arith.constant 0 : i32
    %5 = arith.cmpi slt, %1, %c0_i32_2 : i32
    %6 = arith.xori %4, %5 : i1
    %7 = arith.andi %6, %3 : i1
    %8 = arith.addi %2, %1 : i32
    %9 = arith.select %7, %8, %2 : i32
    %c2_i32_3 = arith.constant 2 : i32
    %10 = arith.muli %c2_i32_3, %arg1 : i32
    %c0_i32_4 = arith.constant 0 : i32
    %11 = arith.subi %c0_i32_4, %10 : i32
    %12 = arith.muli %9, %11 : i32
    %13 = arith.addi %arg1, %12 : i32
    %c0_i32_5 = arith.constant 0 : i32
    %c0_i32_6 = arith.constant 0 : i32
    return %13, %c0_i32_5 : i32, i32
  }
  func.func @transform_4(%arg0: i32, %arg1: i32) -> (i32, i32) {
    %c0_i32 = arith.constant 0 : i32
    %c0_i32_0 = arith.constant 0 : i32
    %c0_i32_1 = arith.constant 0 : i32
    return %c0_i32, %c0_i32_0 : i32, i32
  }
  func.func @transform_5(%arg0: i32, %arg1: i32) -> (i32, i32) {
    %c0_i32 = arith.constant 0 : i32
    %c0_i32_0 = arith.constant 0 : i32
    return %arg0, %c0_i32 : i32, i32
  }
}

</mosaic_0001>

<bundles_post_ra>
// kernel: positionwise_feed_forward.1
= control target key start
LH: loop header
LB: loop body
LE: loop exit
PB: predicated region body
PF: predicated region fallthrough
CT: control target
= control target key end

     0   :  { %10 = vsyncpa [#allocation4], 0  ;;  %s1236_s0 = inlined_call_operand.hbm [shape: f32[128,128], index: 0, kind: input, shape index: {}]   ;;  %s1237_s1 = inlined_call_operand.hbm [shape: bf16[128,256], index: 1, kind: input, shape index: {}]   ;;  %s1238_s2 = inlined_call_operand.vmem [shape: f32[1,256], index: 2, kind: input, shape index: {}]   ;;  %s1239_s3 = inlined_call_operand.hbm [shape: bf16[256,128], index: 3, kind: input, shape index: {}]   ;;  %s1240_s4 = inlined_call_operand.vmem [shape: f32[1,128], index: 4, kind: input, shape index: {}]   ;;  %s1241_s5 = inlined_call_operand.hbm [shape: f32[128,128], index: 5, kind: output, shape index: {}]  }
   0x1   :  { %11 = vsyncpa [#allocation7], 0 }
   0x2   :  { %12 = vsyncpa [#allocation5], 0  ;;  %s45_s20 = sshll.u32 %s1237_s1, 4  ;;  %s1117_s21 = smov [#allocation6]   ;;  %s46_s20 = int_to_ptr.hbm [resolvable:$true] %s45_s20 }
   0x3   :  { %s47_s22 = sshll.u32 %s1117_s21, 4  ;;  %s17_s25 = sshll.u32 %s1236_s0, 4  ;;  %s48_s22 = int_to_ptr.vmem [resolvable:$true] %s47_s22  ;;  %s18_s25 = int_to_ptr.hbm [resolvable:$true] %s17_s25 }
   0x4   :  { %s1118_s26 = smov 128   ;;  %s1119_s27 = smov 8  }
   0x5   :  { %53 = dma.hbm_to_vmem [thread:$0]  %s46_s20, 2048, %s48_s22, [#allocation7], %s1118_s26, %s1118_s26, %s1119_s27  }
   0x6   :  { %s1120_s28 = smov [#allocation3]   ;;  %s104_s1 = sshll.u32 %s1239_s3, 4  ;;  %s105_s1 = int_to_ptr.hbm [resolvable:$true] %s104_s1 }
   0x7   :  { %s19_s29 = sshll.u32 %s1120_s28, 4  ;;  %s1121_s0 = smov [#allocation8]   ;;  %s20_s29 = int_to_ptr.vmem [resolvable:$true] %s19_s29 }
   0x8   :  { %25 = dma.hbm_to_vmem [thread:$0]  %s18_s25, 2048, %s20_s29, [#allocation4], %s1118_s26, %s1118_s26, %s1119_s27  }
   0x9   :  { %s106_s7 = sshll.u32 %s1121_s0, 4  ;;  %s1122_s8 = smov 64   ;;  %s107_s7 = int_to_ptr.vmem [resolvable:$true] %s106_s7 }
   0xa   :  { %s1123_s9 = smov 4  }
   0xb   :  { %112 = dma.hbm_to_vmem [thread:$0]  %s105_s1, 2048, %s107_s7, [#allocation7], %s1122_s8, %s1122_s8, %s1123_s9  }
   0xc   :  { %1111 = dma.done.wait [#allocation4], 2048  }
   0xd   :  { %1112 = vsyncadd [#allocation4], 4294965248 }
   0xe   :  { %1113 = dma.done.wait [#allocation7], 4096  }
   0xf   :  { %1114 = vsyncadd [#allocation7], 4294963200  ;;  %v904_v0 = vld [vmem:[#allocation6 + $0x70] sm:$0xf]  ;;  %v989_v1 = vld [vmem:[#allocation6 + $0x74] sm:$0xf0] }
  0x10   :  { %v988_v2 = vld [vmem:[#allocation6 + $0x74] sm:$0xf]  ;;  %v905_v3 = vor.u32 %v989_v1, %v904_v0  ;;  %v906_v4 = vld [vmem:[#allocation6 + $0x78] sm:$0xf0]  ;;  %v896_v5 = vld [vmem:[#allocation6 + $0x60] sm:$0xf] }
  0x11   :  { %v987_v6 = vld [vmem:[#allocation6 + $0x64] sm:$0xf0]  ;;  %v909_v7 = vor.u32 %v988_v2, %v906_v4  ;;  %v986_v8 = vld [vmem:[#allocation6 + $0x64] sm:$0xf]  ;;  %v898_v9 = vld [vmem:[#allocation6 + $0x68] sm:$0xf0] }
  0x12   :  { %344 = vmatpush.bf16.msra.mxu0 %v905_v3  ;;  %v897_v10 = vor.u32 %v987_v6, %v896_v5  ;;  %v901_v11 = vor.u32 %v986_v8, %v898_v9  ;;  %v888_v12 = vld [vmem:[#allocation6 + $0x50] sm:$0xf]  ;;  %v985_v13 = vld [vmem:[#allocation6 + $0x54] sm:$0xf0]  ;;  %v984_v14 = vld [vmem:[#allocation6 + $0x54] sm:$0xf] }
  0x13   :  { %393 = vmatpush.bf16.msra.mxu1 %v909_v7  ;;  %v890_v15 = vld [vmem:[#allocation6 + $0x58] sm:$0xf0]  ;;  %v889_v16 = vor.u32 %v985_v13, %v888_v12  ;;  %v880_v18 = vld [vmem:[#allocation6 + $0x40] sm:$0xf]  ;;  %v983_v19 = vld [vmem:[#allocation6 + $0x44] sm:$0xf0] }
  0x14   :  { %v893_v17 = vor.u32 %v984_v14, %v890_v15  ;;  %v982_v20 = vld [vmem:[#allocation6 + $0x44] sm:$0xf]  ;;  %v882_v21 = vld [vmem:[#allocation6 + $0x48] sm:$0xf0]  ;;  %v881_v22 = vor.u32 %v983_v19, %v880_v18  ;;  %v872_v24 = vld [vmem:[#allocation6 + $0x30] sm:$0xf] }
  0x15   :  { %v885_v23 = vor.u32 %v982_v20, %v882_v21  ;;  %v981_v25 = vld [vmem:[#allocation6 + $0x34] sm:$0xf0]  ;;  %v980_v26 = vld [vmem:[#allocation6 + $0x34] sm:$0xf]  ;;  %v874_v27 = vld [vmem:[#allocation6 + $0x38] sm:$0xf0] }
  0x16   :  { %345 = vmatpush.bf16.msra.mxu0 %v897_v10  ;;  %v873_v28 = vor.u32 %v981_v25, %v872_v24  ;;  %v877_v29 = vor.u32 %v980_v26, %v874_v27  ;;  %v864_v30 = vld [vmem:[#allocation6 + $0x20] sm:$0xf]  ;;  %v979_v31 = vld [vmem:[#allocation6 + $0x24] sm:$0xf0]  ;;  %v978_v32 = vld [vmem:[#allocation6 + $0x24] sm:$0xf] }
  0x17   :  { %394 = vmatpush.bf16.msra.mxu1 %v901_v11  ;;  %v866_v33 = vld [vmem:[#allocation6 + $0x28] sm:$0xf0]  ;;  %v865_v34 = vor.u32 %v979_v31, %v864_v30  ;;  %v856_v36 = vld [vmem:[#allocation6 + $0x10] sm:$0xf]  ;;  %v977_v37 = vld [vmem:[#allocation6 + $0x14] sm:$0xf0] }
  0x18   :  { %v869_v35 = vor.u32 %v978_v32, %v866_v33  ;;  %v976_v38 = vld [vmem:[#allocation6 + $0x14] sm:$0xf]  ;;  %v858_v39 = vld [vmem:[#allocation6 + $0x18] sm:$0xf0]  ;;  %v857_v40 = vor.u32 %v977_v37, %v856_v36  ;;  %v848_v42 = vld [vmem:[#allocation6] sm:$0xf] }
  0x19   :  { %v861_v41 = vor.u32 %v976_v38, %v858_v39  ;;  %v975_v43 = vld [vmem:[#allocation6 + $0x4] sm:$0xf0]  ;;  %v974_v44 = vld [vmem:[#allocation6 + $0x4] sm:$0xf]  ;;  %v850_v45 = vld [vmem:[#allocation6 + $0x8] sm:$0xf0] }
  0x1a   :  { %346 = vmatpush.bf16.msra.mxu0 %v889_v16  ;;  %v849_v46 = vor.u32 %v975_v43, %v848_v42  ;;  %v218_v47 = vld [vmem:[#allocation3] sm:$0xff]  ;;  %v219_v48 = vld [vmem:[#allocation3 + $0x8] sm:$0xff]  ;;  %v853_v49 = vor.u32 %v974_v44, %v850_v45  ;;  %v220_v51 = vld [vmem:[#allocation3 + $0x10] sm:$0xff]  ;;  %s825_s15 = sshll.u32 %s1241_s5, 4  ;;  %s826_s15 = int_to_ptr.hbm [resolvable:$true] %s825_s15 }
  0x1b   :  { %395 = vmatpush.bf16.msra.mxu1 %v893_v17  ;;  %v234_v50 = vpack.c.bf16 %v219_v48, %v218_v47  ;;  %v221_v52 = vld [vmem:[#allocation3 + $0x18] sm:$0xff]  ;;  %v222_v54 = vld [vmem:[#allocation3 + $0x20] sm:$0xff]  ;;  %v223_v55 = vld [vmem:[#allocation3 + $0x28] sm:$0xff] }
  0x1c   :  { %v235_v53 = vpack.c.bf16 %v221_v52, %v220_v51  ;;  %v236_v56 = vpack.c.bf16 %v223_v55, %v222_v54  ;;  %v224_v57 = vld [vmem:[#allocation3 + $0x30] sm:$0xff]  ;;  %v225_v58 = vld [vmem:[#allocation3 + $0x38] sm:$0xff]  ;;  %v226_v60 = vld [vmem:[#allocation3 + $0x40] sm:$0xff] }
  0x1d   :  { %v237_v59 = vpack.c.bf16 %v225_v58, %v224_v57  ;;  %v227_v61 = vld [vmem:[#allocation3 + $0x48] sm:$0xff]  ;;  %v997_v63 = vld [vmem:[#allocation8 + $0x38] sm:$0xff]  ;;  %v228_v1 = vld [vmem:[#allocation3 + $0x50] sm:$0xff] }
  0x1e   :  { %347 = vmatpush.bf16.msra.mxu0 %v881_v22  ;;  %v238_v62 = vpack.c.bf16 %v227_v61, %v226_v60  ;;  %v1005_v0 = vld [vmem:[#allocation8 + $0x78] sm:$0xff]  ;;  %634 = vmatpush.bf16.msra.mxu2 %v997_v63  ;;  %v996_v4 = vld [vmem:[#allocation8 + $0x30] sm:$0xff]  ;;  %v995_v6 = vld [vmem:[#allocation8 + $0x28] sm:$0xff] }
  0x1f   :  { %396 = vmatpush.bf16.msra.mxu1 %v885_v23  ;;  %683 = vmatpush.bf16.msra.mxu3 %v1005_v0  ;;  %v229_v2 = vld [vmem:[#allocation3 + $0x58] sm:$0xff]  ;;  %v1004_v5 = vld [vmem:[#allocation8 + $0x70] sm:$0xff]  ;;  %v1003_v7 = vld [vmem:[#allocation8 + $0x68] sm:$0xff] }
  0x20   :  { %v239_v3 = vpack.c.bf16 %v229_v2, %v228_v1  ;;  %v994_v8 = vld [vmem:[#allocation8 + $0x20] sm:$0xff]  ;;  %v231_v11 = vld [vmem:[#allocation3 + $0x68] sm:$0xff]  ;;  %v993_v13 = vld [vmem:[#allocation8 + $0x18] sm:$0xff] }
  0x21   :  { %v1002_v9 = vld [vmem:[#allocation8 + $0x60] sm:$0xff]  ;;  %v1001_v14 = vld [vmem:[#allocation8 + $0x58] sm:$0xff]  ;;  %v992_v15 = vld [vmem:[#allocation8 + $0x10] sm:$0xff] }
  0x22   :  { %348 = vmatpush.bf16.msra.mxu0 %v873_v28  ;;  %635 = vmatpush.bf16.msra.mxu2 %v996_v4  ;;  %v230_v10 = vld [vmem:[#allocation3 + $0x60] sm:$0xff]  ;;  %v1000_v16 = vld [vmem:[#allocation8 + $0x50] sm:$0xff]  ;;  %v991_v17 = vld [vmem:[#allocation8 + $0x8] sm:$0xff] }
  0x23   :  { %397 = vmatpush.bf16.msra.mxu1 %v877_v29  ;;  %684 = vmatpush.bf16.msra.mxu3 %v1004_v5  ;;  %v240_v12 = vpack.c.bf16 %v231_v11, %v230_v10  ;;  %v999_v18 = vld [vmem:[#allocation8 + $0x48] sm:$0xff]  ;;  %v990_v19 = vld [vmem:[#allocation8] sm:$0xff]  ;;  %v232_v21 = vld [vmem:[#allocation3 + $0x70] sm:$0xff] }
  0x24   :  { %v998_v20 = vld [vmem:[#allocation8 + $0x40] sm:$0xff]  ;;  %v233_v22 = vld [vmem:[#allocation3 + $0x78] sm:$0xff] }
  0x25   :  { %v241_v23 = vpack.c.bf16 %v233_v22, %v232_v21  ;;  %v258_v24 = vld [vmem:[%s1238_s2] sm:$0x3] }
  0x26   :  { %349 = vmatpush.bf16.msra.mxu0 %v865_v34  ;;  %636 = vmatpush.bf16.msra.mxu2 %v995_v6  ;;  %v1173_v27 = vperm.slane %v258_v24, 0  ;;  %v1175_v28 = vperm.slane %v258_v24, 1 }
  0x27   :  { %398 = vmatpush.bf16.msra.mxu1 %v869_v35  ;;  %685 = vmatpush.bf16.msra.mxu3 %v1003_v7 }
  0x2a   :  { %350 = vmatpush.bf16.msra.mxu0 %v857_v40  ;;  %637 = vmatpush.bf16.msra.mxu2 %v994_v8 }
  0x2b   :  { %399 = vmatpush.bf16.msra.mxu1 %v861_v41  ;;  %686 = vmatpush.bf16.msra.mxu3 %v1002_v9 }
  0x2e   :  { %351 = vmatpush.bf16.msra.mxu0 %v849_v46  ;;  %638 = vmatpush.bf16.msra.mxu2 %v993_v13 }
  0x2f   :  { %400 = vmatpush.bf16.msra.mxu1 %v853_v49  ;;  %687 = vmatpush.bf16.msra.mxu3 %v1001_v14 }
  0x31   :  { %352 = vmatmul.bf16.vlgmr.msra.gmra.mxu0 %v234_v50 }
  0x32   :  { %401 = vmatmul.bf16.vlgmr.msra.gmra.mxu1 %v234_v50  ;;  %639 = vmatpush.bf16.msra.mxu2 %v992_v15 }
  0x33   :  { %688 = vmatpush.bf16.msra.mxu3 %v1000_v16 }
  0x36   :  { %640 = vmatpush.bf16.msra.mxu2 %v991_v17 }
  0x37   :  { %689 = vmatpush.bf16.msra.mxu3 %v999_v18 }
  0x3a   :  { %641 = vmatpush.bf16.msra.mxu2 %v990_v19 }
  0x3b   :  { %690 = vmatpush.bf16.msra.mxu3 %v998_v20 }
  0x41   :  { %357 = vmatmul.bf16.gmra.mxu0 %v235_v53 }
  0x42   :  { %406 = vmatmul.bf16.gmra.mxu1 %v235_v53 }
  0x51   :  { %362 = vmatmul.bf16.gmra.mxu0 %v236_v56 }
  0x52   :  { %411 = vmatmul.bf16.gmra.mxu1 %v236_v56 }
  0x61   :  { %367 = vmatmul.bf16.gmra.mxu0 %v237_v59 }
  0x62   :  { %416 = vmatmul.bf16.gmra.mxu1 %v237_v59 }
  0x71   :  { %372 = vmatmul.bf16.gmra.mxu0 %v238_v62 }
  0x72   :  { %421 = vmatmul.bf16.gmra.mxu1 %v238_v62 }
  0x81   :  { %377 = vmatmul.bf16.gmra.mxu0 %v239_v3 }
  0x82   :  { %426 = vmatmul.bf16.gmra.mxu1 %v239_v3 }
  0x91   :  { %382 = vmatmul.bf16.gmra.mxu0 %v240_v12 }
  0x92   :  { %431 = vmatmul.bf16.gmra.mxu1 %v240_v12 }
  0xa1   :  { %387 = vmatmul.bf16.gmra.mxu0 %v241_v23 }
  0xa2   :  { %436 = vmatmul.bf16.gmra.mxu1 %v241_v23 }
  0xae   :  { %v353_v25 = vpop.f32.mrf.mxu0 }
  0xaf   :  { %v402_v26 = vpop.f32.mrf.mxu1  ;;  %v354_v29 = vadd.f32 %v353_v25, %v1173_v27 }
  0xb0   :  { %v403_v30 = vadd.f32 %v402_v26, %v1175_v28 }
  0xb1   :  { %v442_v35 = vmax.f32 %v354_v29, 0.0 }
  0xb2   :  { %v443_v37 = vmax.f32 %v403_v30, 0.0 }
  0xb6   :  { %v355_v31 = vpop.f32.mrf.mxu0 }
  0xb7   :  { %v356_v32 = vadd.f32 %v355_v31, %v1173_v27  ;;  %v404_v33 = vpop.f32.mrf.mxu1 }
  0xb8   :  { %v405_v34 = vadd.f32 %v404_v33, %v1175_v28 }
  0xb9   :  { %v444_v36 = vmax.f32 %v356_v32, 0.0 }
  0xba   :  { %v445_v38 = vmax.f32 %v405_v34, 0.0 }
  0xbb   :  { %v490_v39 = vpack.c.bf16 %v444_v36, %v442_v35 }
  0xbc   :  { %v491_v40 = vpack.c.bf16 %v445_v38, %v443_v37 }
  0xbd   :  { %642 = vmatmul.bf16.vlgmr.msra.gmra.mxu2 %v490_v39 }
  0xbe   :  { %691 = vmatmul.bf16.vlgmr.msra.gmra.mxu3 %v491_v40  ;;  %v358_v41 = vpop.f32.mrf.mxu0 }
  0xbf   :  { %v407_v42 = vpop.f32.mrf.mxu1  ;;  %v359_v43 = vadd.f32 %v358_v41, %v1173_v27 }
  0xc0   :  { %v408_v44 = vadd.f32 %v407_v42, %v1175_v28 }
  0xc1   :  { %v446_v49 = vmax.f32 %v359_v43, 0.0 }
  0xc2   :  { %v447_v51 = vmax.f32 %v408_v44, 0.0 }
  0xc6   :  { %v360_v45 = vpop.f32.mrf.mxu0 }
  0xc7   :  { %v361_v46 = vadd.f32 %v360_v45, %v1173_v27  ;;  %v409_v47 = vpop.f32.mrf.mxu1 }
  0xc8   :  { %v410_v48 = vadd.f32 %v409_v47, %v1175_v28 }
  0xc9   :  { %v448_v50 = vmax.f32 %v361_v46, 0.0 }
  0xca   :  { %v449_v52 = vmax.f32 %v410_v48, 0.0 }
  0xcb   :  { %v492_v53 = vpack.c.bf16 %v448_v50, %v446_v49 }
  0xcc   :  { %v493_v54 = vpack.c.bf16 %v449_v52, %v447_v51 }
  0xcd   :  { %647 = vmatmul.bf16.gmra.mxu2 %v492_v53 }
  0xce   :  { %696 = vmatmul.bf16.gmra.mxu3 %v493_v54  ;;  %v363_v55 = vpop.f32.mrf.mxu0 }
  0xcf   :  { %v412_v56 = vpop.f32.mrf.mxu1  ;;  %v364_v57 = vadd.f32 %v363_v55, %v1173_v27 }
  0xd0   :  { %v413_v58 = vadd.f32 %v412_v56, %v1175_v28 }
  0xd1   :  { %v450_v63 = vmax.f32 %v364_v57, 0.0 }
  0xd2   :  { %v451_v1 = vmax.f32 %v413_v58, 0.0 }
  0xd6   :  { %v365_v59 = vpop.f32.mrf.mxu0 }
  0xd7   :  { %v366_v60 = vadd.f32 %v365_v59, %v1173_v27  ;;  %v414_v61 = vpop.f32.mrf.mxu1 }
  0xd8   :  { %v415_v62 = vadd.f32 %v414_v61, %v1175_v28 }
  0xd9   :  { %v452_v0 = vmax.f32 %v366_v60, 0.0 }
  0xda   :  { %v453_v2 = vmax.f32 %v415_v62, 0.0 }
  0xdb   :  { %v494_v3 = vpack.c.bf16 %v452_v0, %v450_v63 }
  0xdc   :  { %v495_v4 = vpack.c.bf16 %v453_v2, %v451_v1 }
  0xdd   :  { %652 = vmatmul.bf16.gmra.mxu2 %v494_v3 }
  0xde   :  { %701 = vmatmul.bf16.gmra.mxu3 %v495_v4  ;;  %v368_v5 = vpop.f32.mrf.mxu0 }
  0xdf   :  { %v417_v6 = vpop.f32.mrf.mxu1  ;;  %v369_v7 = vadd.f32 %v368_v5, %v1173_v27 }
  0xe0   :  { %v418_v8 = vadd.f32 %v417_v6, %v1175_v28 }
  0xe1   :  { %v454_v13 = vmax.f32 %v369_v7, 0.0 }
  0xe2   :  { %v455_v15 = vmax.f32 %v418_v8, 0.0 }
  0xe6   :  { %v370_v9 = vpop.f32.mrf.mxu0 }
  0xe7   :  { %v371_v10 = vadd.f32 %v370_v9, %v1173_v27  ;;  %v419_v11 = vpop.f32.mrf.mxu1 }
  0xe8   :  { %v420_v12 = vadd.f32 %v419_v11, %v1175_v28 }
  0xe9   :  { %v456_v14 = vmax.f32 %v371_v10, 0.0 }
  0xea   :  { %v457_v16 = vmax.f32 %v420_v12, 0.0 }
  0xeb   :  { %v496_v17 = vpack.c.bf16 %v456_v14, %v454_v13  ;;  %v1212_v14 = vld [vmem:[%s1240_s4] ss:$0 sm:$0xff]  ;;  %s1124_s4 = smov [#allocation9]  }
  0xec   :  { %v497_v18 = vpack.c.bf16 %v457_v16, %v455_v15  ;;  %s823_s12 = sshll.u32 %s1124_s4, 4  ;;  %s824_s12 = int_to_ptr.vmem [resolvable:$true] %s823_s12 }
  0xed   :  { %657 = vmatmul.bf16.gmra.mxu2 %v496_v17 }
  0xee   :  { %706 = vmatmul.bf16.gmra.mxu3 %v497_v18  ;;  %v373_v19 = vpop.f32.mrf.mxu0 }
  0xef   :  { %v422_v20 = vpop.f32.mrf.mxu1  ;;  %v374_v21 = vadd.f32 %v373_v19, %v1173_v27 }
  0xf0   :  { %v423_v22 = vadd.f32 %v422_v20, %v1175_v28 }
  0xf1   :  { %v458_v29 = vmax.f32 %v374_v21, 0.0 }
  0xf2   :  { %v459_v31 = vmax.f32 %v423_v22, 0.0 }
  0xf6   :  { %v375_v23 = vpop.f32.mrf.mxu0 }
  0xf7   :  { %v376_v24 = vadd.f32 %v375_v23, %v1173_v27  ;;  %v424_v25 = vpop.f32.mrf.mxu1 }
  0xf8   :  { %v425_v26 = vadd.f32 %v424_v25, %v1175_v28 }
  0xf9   :  { %v460_v30 = vmax.f32 %v376_v24, 0.0 }
  0xfa   :  { %v461_v32 = vmax.f32 %v425_v26, 0.0 }
  0xfb   :  { %v498_v33 = vpack.c.bf16 %v460_v30, %v458_v29 }
  0xfc   :  { %v499_v34 = vpack.c.bf16 %v461_v32, %v459_v31 }
  0xfd   :  { %662 = vmatmul.bf16.gmra.mxu2 %v498_v33 }
  0xfe   :  { %711 = vmatmul.bf16.gmra.mxu3 %v499_v34  ;;  %v378_v35 = vpop.f32.mrf.mxu0 }
  0xff   :  { %v427_v36 = vpop.f32.mrf.mxu1  ;;  %v379_v37 = vadd.f32 %v378_v35, %v1173_v27 }
 0x100   :  { %v428_v38 = vadd.f32 %v427_v36, %v1175_v28 }
 0x101   :  { %v462_v43 = vmax.f32 %v379_v37, 0.0 }
 0x102   :  { %v463_v45 = vmax.f32 %v428_v38, 0.0 }
 0x106   :  { %v380_v39 = vpop.f32.mrf.mxu0 }
 0x107   :  { %v381_v40 = vadd.f32 %v380_v39, %v1173_v27  ;;  %v429_v41 = vpop.f32.mrf.mxu1 }
 0x108   :  { %v430_v42 = vadd.f32 %v429_v41, %v1175_v28 }
 0x109   :  { %v464_v44 = vmax.f32 %v381_v40, 0.0 }
 0x10a   :  { %v465_v46 = vmax.f32 %v430_v42, 0.0 }
 0x10b   :  { %v500_v47 = vpack.c.bf16 %v464_v44, %v462_v43 }
 0x10c   :  { %v501_v48 = vpack.c.bf16 %v465_v46, %v463_v45 }
 0x10d   :  { %667 = vmatmul.bf16.gmra.mxu2 %v500_v47 }
 0x10e   :  { %716 = vmatmul.bf16.gmra.mxu3 %v501_v48  ;;  %v383_v49 = vpop.f32.mrf.mxu0 }
 0x10f   :  { %v432_v50 = vpop.f32.mrf.mxu1  ;;  %v384_v51 = vadd.f32 %v383_v49, %v1173_v27 }
 0x110   :  { %v433_v52 = vadd.f32 %v432_v50, %v1175_v28 }
 0x111   :  { %v466_v57 = vmax.f32 %v384_v51, 0.0 }
 0x112   :  { %v467_v59 = vmax.f32 %v433_v52, 0.0 }
 0x116   :  { %v385_v53 = vpop.f32.mrf.mxu0 }
 0x117   :  { %v386_v54 = vadd.f32 %v385_v53, %v1173_v27  ;;  %v434_v55 = vpop.f32.mrf.mxu1 }
 0x118   :  { %v435_v56 = vadd.f32 %v434_v55, %v1175_v28 }
 0x119   :  { %v468_v58 = vmax.f32 %v386_v54, 0.0 }
 0x11a   :  { %v469_v60 = vmax.f32 %v435_v56, 0.0 }
 0x11b   :  { %v502_v61 = vpack.c.bf16 %v468_v58, %v466_v57 }
 0x11c   :  { %v503_v62 = vpack.c.bf16 %v469_v60, %v467_v59 }
 0x11d   :  { %672 = vmatmul.bf16.gmra.mxu2 %v502_v61 }
 0x11e   :  { %721 = vmatmul.bf16.gmra.mxu3 %v503_v62  ;;  %v388_v63 = vpop.f32.mrf.mxu0 }
 0x11f   :  { %v437_v0 = vpop.f32.mrf.mxu1  ;;  %v389_v1 = vadd.f32 %v388_v63, %v1173_v27 }
 0x120   :  { %v438_v2 = vadd.f32 %v437_v0, %v1175_v28 }
 0x121   :  { %v470_v7 = vmax.f32 %v389_v1, 0.0 }
 0x122   :  { %v471_v9 = vmax.f32 %v438_v2, 0.0 }
 0x126   :  { %v390_v3 = vpop.f32.mrf.mxu0 }
 0x127   :  { %v391_v4 = vadd.f32 %v390_v3, %v1173_v27  ;;  %v439_v5 = vpop.f32.mrf.mxu1 }
 0x128   :  { %v440_v6 = vadd.f32 %v439_v5, %v1175_v28 }
 0x129   :  { %v472_v8 = vmax.f32 %v391_v4, 0.0 }
 0x12a   :  { %v473_v10 = vmax.f32 %v440_v6, 0.0 }
 0x12b   :  { %v504_v11 = vpack.c.bf16 %v472_v8, %v470_v7 }
 0x12c   :  { %v505_v12 = vpack.c.bf16 %v473_v10, %v471_v9 }
 0x12d   :  { %677 = vmatmul.bf16.gmra.mxu2 %v504_v11 }
 0x12e   :  { %726 = vmatmul.bf16.gmra.mxu3 %v505_v12 }
 0x140   :  { %v643_v13 = vpop.f32.mrf.mxu2 }
 0x141   :  { %v692_v15 = vpop.f32.mrf.mxu3 }
 0x142   :  { %v693_v16 = vadd.f32 %v692_v15, %v643_v13 }
 0x144   :  { %v787_v27 = vadd.f32 %v1212_v14, %v693_v16 }
 0x146   :  { %803 = vst [vmem:[#allocation9] sm:$0xff] %v787_v27 }
 0x148   :  { %v645_v28 = vpop.f32.mrf.mxu2 }
 0x149   :  { %v694_v17 = vpop.f32.mrf.mxu3 }
 0x14a   :  { %v695_v18 = vadd.f32 %v694_v17, %v645_v28 }
 0x14c   :  { %v788_v19 = vadd.f32 %v1212_v14, %v695_v18 }
 0x14e   :  { %804 = vst [vmem:[#allocation9 + $0x8] sm:$0xff] %v788_v19 }
 0x150   :  { %v648_v20 = vpop.f32.mrf.mxu2 }
 0x151   :  { %v697_v21 = vpop.f32.mrf.mxu3 }
 0x152   :  { %v698_v22 = vadd.f32 %v697_v21, %v648_v20 }
 0x154   :  { %v789_v23 = vadd.f32 %v1212_v14, %v698_v22 }
 0x156   :  { %805 = vst [vmem:[#allocation9 + $0x10] sm:$0xff] %v789_v23 }
 0x158   :  { %v650_v24 = vpop.f32.mrf.mxu2 }
 0x159   :  { %v699_v25 = vpop.f32.mrf.mxu3 }
 0x15a   :  { %v700_v26 = vadd.f32 %v699_v25, %v650_v24 }
 0x15c   :  { %v790_v29 = vadd.f32 %v1212_v14, %v700_v26 }
 0x15e   :  { %806 = vst [vmem:[#allocation9 + $0x18] sm:$0xff] %v790_v29 }
 0x160   :  { %v653_v30 = vpop.f32.mrf.mxu2 }
 0x161   :  { %v702_v31 = vpop.f32.mrf.mxu3 }
 0x162   :  { %v703_v32 = vadd.f32 %v702_v31, %v653_v30 }
 0x164   :  { %v791_v33 = vadd.f32 %v1212_v14, %v703_v32 }
 0x166   :  { %807 = vst [vmem:[#allocation9 + $0x20] sm:$0xff] %v791_v33 }
 0x168   :  { %v655_v34 = vpop.f32.mrf.mxu2 }
 0x169   :  { %v704_v35 = vpop.f32.mrf.mxu3 }
 0x16a   :  { %v705_v36 = vadd.f32 %v704_v35, %v655_v34 }
 0x16c   :  { %v792_v37 = vadd.f32 %v1212_v14, %v705_v36 }
 0x16e   :  { %808 = vst [vmem:[#allocation9 + $0x28] sm:$0xff] %v792_v37 }
 0x170   :  { %v658_v38 = vpop.f32.mrf.mxu2 }
 0x171   :  { %v707_v39 = vpop.f32.mrf.mxu3 }
 0x172   :  { %v708_v40 = vadd.f32 %v707_v39, %v658_v38 }
 0x174   :  { %v793_v41 = vadd.f32 %v1212_v14, %v708_v40 }
 0x176   :  { %809 = vst [vmem:[#allocation9 + $0x30] sm:$0xff] %v793_v41 }
 0x178   :  { %v660_v42 = vpop.f32.mrf.mxu2 }
 0x179   :  { %v709_v43 = vpop.f32.mrf.mxu3 }
 0x17a   :  { %v710_v44 = vadd.f32 %v709_v43, %v660_v42 }
 0x17c   :  { %v794_v45 = vadd.f32 %v1212_v14, %v710_v44 }
 0x17e   :  { %810 = vst [vmem:[#allocation9 + $0x38] sm:$0xff] %v794_v45 }
 0x180   :  { %v663_v46 = vpop.f32.mrf.mxu2 }
 0x181   :  { %v712_v47 = vpop.f32.mrf.mxu3 }
 0x182   :  { %v713_v48 = vadd.f32 %v712_v47, %v663_v46 }
 0x184   :  { %v795_v49 = vadd.f32 %v1212_v14, %v713_v48 }
 0x186   :  { %811 = vst [vmem:[#allocation9 + $0x40] sm:$0xff] %v795_v49 }
 0x188   :  { %v665_v50 = vpop.f32.mrf.mxu2 }
 0x189   :  { %v714_v51 = vpop.f32.mrf.mxu3 }
 0x18a   :  { %v715_v52 = vadd.f32 %v714_v51, %v665_v50 }
 0x18c   :  { %v796_v53 = vadd.f32 %v1212_v14, %v715_v52 }
 0x18e   :  { %812 = vst [vmem:[#allocation9 + $0x48] sm:$0xff] %v796_v53 }
 0x190   :  { %v668_v54 = vpop.f32.mrf.mxu2 }
 0x191   :  { %v717_v55 = vpop.f32.mrf.mxu3 }
 0x192   :  { %v718_v56 = vadd.f32 %v717_v55, %v668_v54 }
 0x194   :  { %v797_v57 = vadd.f32 %v1212_v14, %v718_v56 }
 0x196   :  { %813 = vst [vmem:[#allocation9 + $0x50] sm:$0xff] %v797_v57 }
 0x198   :  { %v670_v58 = vpop.f32.mrf.mxu2 }
 0x199   :  { %v719_v59 = vpop.f32.mrf.mxu3 }
 0x19a   :  { %v720_v60 = vadd.f32 %v719_v59, %v670_v58 }
 0x19c   :  { %v798_v61 = vadd.f32 %v1212_v14, %v720_v60 }
 0x19e   :  { %814 = vst [vmem:[#allocation9 + $0x58] sm:$0xff] %v798_v61 }
 0x1a0   :  { %v673_v62 = vpop.f32.mrf.mxu2 }
 0x1a1   :  { %v722_v63 = vpop.f32.mrf.mxu3 }
 0x1a2   :  { %v723_v0 = vadd.f32 %v722_v63, %v673_v62 }
 0x1a4   :  { %v799_v1 = vadd.f32 %v1212_v14, %v723_v0 }
 0x1a6   :  { %815 = vst [vmem:[#allocation9 + $0x60] sm:$0xff] %v799_v1 }
 0x1a8   :  { %v675_v2 = vpop.f32.mrf.mxu2 }
 0x1a9   :  { %v724_v3 = vpop.f32.mrf.mxu3 }
 0x1aa   :  { %v725_v4 = vadd.f32 %v724_v3, %v675_v2 }
 0x1ac   :  { %v800_v5 = vadd.f32 %v1212_v14, %v725_v4 }
 0x1ae   :  { %816 = vst [vmem:[#allocation9 + $0x68] sm:$0xff] %v800_v5 }
 0x1b0   :  { %v678_v6 = vpop.f32.mrf.mxu2 }
 0x1b1   :  { %v727_v7 = vpop.f32.mrf.mxu3 }
 0x1b2   :  { %v728_v8 = vadd.f32 %v727_v7, %v678_v6 }
 0x1b4   :  { %v801_v9 = vadd.f32 %v1212_v14, %v728_v8 }
 0x1b6   :  { %817 = vst [vmem:[#allocation9 + $0x70] sm:$0xff] %v801_v9 }
 0x1b8   :  { %v680_v10 = vpop.f32.mrf.mxu2 }
 0x1b9   :  { %v729_v11 = vpop.f32.mrf.mxu3 }
 0x1ba   :  { %v730_v12 = vadd.f32 %v729_v11, %v680_v10 }
 0x1bc   :  { %v802_v13 = vadd.f32 %v1212_v14, %v730_v12 }
 0x1be   :  { %818 = vst [vmem:[#allocation9 + $0x78] sm:$0xff] %v802_v13 }
 0x1bf   :  { %831 = dma.vmem_to_hbm [thread:$0]  %s824_s12, 2048, %s826_s15, [#allocation5], %s1118_s26, %s1118_s26, %s1119_s27  }
 0x1c0   :  { %1115 = dma.done.wait [#allocation5], 2048  }
 0x1c1   :  { %1116 = vsyncadd [#allocation5], 4294965248 }
 0x1c2   :  { %836 = vsyncpa [#allocation4], 1 }
 0x1c3   :  { %837 = vsyncpa [#allocation7], 1 }
 0x1c4   :  { %838 = vsyncpa [#allocation5], 1 }

</bundles_post_ra>
